<compile_context>
chip_gen: v6e
topology: v6e:2x2x1
jax: 0.10.0
libtpu: 0.0.40
codegen_flags: <defaults>
</compile_context>

<pallas_src>
import functools

import jax
import jax.numpy as jnp
from jax.experimental import pallas as pl
from jax.experimental.pallas import tpu as pltpu


def _round_up(x: int, m: int) -> int:
    return ((x + m - 1) // m) * m


# ----------------------------------------------------------------------------- kernel
def _cls_head_kernel(x_ref, w1_ref, b1_ref, w2_ref, b2_ref, o_ref):
    # ---- Linear1 (BN1 pre-folded) + ReLU: bf16 operands, f32 MXU accumulation ----
    h = jnp.dot(x_ref[...].astype(jnp.bfloat16), w1_ref[...],
                preferred_element_type=jnp.float32) + b1_ref[...]
    h = jnp.maximum(h, 0.0)

    # ---- Linear2 (BN2 pre-folded): bf16 operands, f32 accumulation ----
    logits = jnp.dot(h.astype(jnp.bfloat16), w2_ref[...],
                     preferred_element_type=jnp.float32) + b2_ref[...]

    # ---- Softmax over padded class lanes (f32 end-to-end; padded bias -1e30 -> 0) ----
    m = jnp.max(logits, axis=-1, keepdims=True)
    e = jnp.exp(logits - m)
    denom = jnp.sum(e, axis=-1, keepdims=True)
    r = pl.reciprocal(denom, approx=True)      # EUP vrcp (free slot)
    r = r * (2.0 - denom * r)                  # one Newton step -> ~f32 accuracy
    o_ref[...] = (e * r).astype(o_ref.dtype)   # bf16 writeback


# ----------------------------------------------------------------------------- sizing
def _vmem_budget_bytes() -> int:
    """~75% of this generation's physical VMEM (v7x 64 MiB -> 48, v5e/v6e 128 -> 96)."""
    cap = None
    try:
        info = pltpu.get_tpu_info()
        for attr in ("vmem_capacity_bytes", "vmem_size_bytes", "vmem_bytes"):
            v = getattr(info, attr, None)
            if v:
                cap = int(v)
                break
    except Exception:
        pass
    if cap is None:
        cap = 64 << 20                         # conservative (v7x-sized) fallback
    return min((cap * 3) // 4, 112 << 20)


def _max_tb_for_vmem(F, E, Cp, budget, x_bytes, out_bytes) -> int:
    """Largest batch tile whose buffers fit the VMEM budget with resident weights."""
    # Weights counted double-buffered (conservative: covers the no-Buffered(1) fallback).
    weights = 2 * (2 * (F * E + E * Cp) + 4 * (E + Cp))
    # Per-row: double-buffered x/out tiles + f32 intermediates (h, logits, e).
    per_row = 2 * F * x_bytes + 2 * Cp * out_bytes + 4 * (E + 2 * Cp)
    avail = budget - weights - (2 << 20)       # slack for compiler-internal scratch
    if avail <= per_row * 8:
        # TODO(synk): weights too large to keep VMEM-resident on this generation ->
        # would need a second grid axis over E/Cp with a two-pass softmax.
        raise ValueError(
            f"resident weights ({weights} B) exceed VMEM budget ({budget} B); "
            "class/embedding tiling is not implemented for this head.")
    return max(8, ((avail // per_row) // 8) * 8)


def _choose_batch_tiling(B, tb_limit):
    """Balanced batch tiles; >=2 tiles when possible so both v7x TCs get work."""
    b8 = _round_up(B, 8)
    tb_max = max(8, min(_round_up(tb_limit, 8), b8))
    nb = pl.cdiv(b8, tb_max)
    if nb < 2 and b8 >= 16:
        nb = 2                                 # v7x megacore; harmless on 1-TC chips
    tb = _round_up(pl.cdiv(b8, nb), 8)
    return nb * tb, tb, nb


def _resident_spec(shape):
    """Grid-invariant operand: VMEM-resident; single-buffered when supported."""
    try:
        return pl.BlockSpec(shape, lambda i: (0, 0), pipeline_mode=pl.Buffered(1))
    except Exception:
        return pl.BlockSpec(shape, lambda i: (0, 0))


# ----------------------------------------------------------------------------- wrapper
def classification_output_layer(x, folded, num_classes, *, block_b=1024):
    """x: (B, F) f32 or bf16.  folded: dict from fold_params().  Returns (B, C) f32."""
    B, F = x.shape
    E = folded["w1"].shape[1]
    Cp = folded["w2"].shape[1]                 # padded (lane-dense) class count
    x_bytes = jnp.dtype(x.dtype).itemsize
    out_bytes = 2                              # bf16 probability writeback

    budget = _vmem_budget_bytes()
    tb_cap = _max_tb_for_vmem(F, E, Cp, budget, x_bytes, out_bytes)
    b_pad, tb, nb = _choose_batch_tiling(B, min(block_b, tb_cap))
    if b_pad != B:
        x = jnp.pad(x, ((0, b_pad - B), (0, 0)))

    cost = pl.CostEstimate(
        flops=2 * b_pad * (F * E + E * Cp),
        transcendentals=b_pad * (Cp + 1),
        bytes_accessed=(x_bytes * b_pad * F + 2 * (F * E + E * Cp)
                        + 4 * (E + Cp) + out_bytes * b_pad * Cp),
    )

    out = pl.pallas_call(
        _cls_head_kernel,
        out_shape=jax.ShapeDtypeStruct((b_pad, Cp), jnp.bfloat16),
        grid=(nb,),
        in_specs=[
            pl.BlockSpec((tb, F), lambda i: (i, 0)),   # x: streamed per batch tile
            _resident_spec((F, E)),                    # w1 (bf16): VMEM-resident
            _resident_spec((1, E)),                    # b1 (f32)
            _resident_spec((E, Cp)),                   # w2 (bf16): VMEM-resident
            _resident_spec((1, Cp)),                   # b2 (f32, padded cols = -1e30)
        ],
        out_specs=pl.BlockSpec((tb, Cp), lambda i: (i, 0)),
        compiler_params=pltpu.CompilerParams(
            dimension_semantics=("parallel",),
            vmem_limit_bytes=budget,
        ),
        cost_estimate=cost,
    )(x, folded["w1"], folded["b1"], folded["w2"], folded["b2"])

    # Tiny (B, C) post-pass; a fused consumer could take the padded bf16 slab directly.
    return out[:B, :num_classes].astype(jnp.float32)


# ----------------------------------------------------------------------------- params
def make_raw_params(key, input_features, emb_size, num_classes):
    """Deterministic synthetic parameters matching the PyTorch module (eval mode)."""
    ks = jax.random.split(key, 12)
    f, e, c = input_features, emb_size, num_classes
    return {
        # BatchNorm1d(input_features)
        "bn1_w": 1.0 + 0.1 * jax.random.normal(ks[0], (f,), jnp.float32),
        "bn1_b": 0.1 * jax.random.normal(ks[1], (f,), jnp.float32),
        "bn1_mean": 0.1 * jax.random.normal(ks[2], (f,), jnp.float32),
        "bn1_var": jnp.abs(jax.random.normal(ks[3], (f,), jnp.float32)) + 0.5,
        # Linear(input_features, emb_size) — stored transposed vs PyTorch: (F, E)
        "w1": jax.random.normal(ks[4], (f, e), jnp.float32) * (1.0 / jnp.sqrt(f)),
        "b1": 0.01 * jax.random.normal(ks[5], (e,), jnp.float32),
        # BatchNorm1d(emb_size)
        "bn2_w": 1.0 + 0.1 * jax.random.normal(ks[6], (e,), jnp.float32),
        "bn2_b": 0.1 * jax.random.normal(ks[7], (e,), jnp.float32),
        "bn2_mean": 0.1 * jax.random.normal(ks[8], (e,), jnp.float32),
        "bn2_var": jnp.abs(jax.random.normal(ks[9], (e,), jnp.float32)) + 0.5,
        # Linear(emb_size, num_classes) — stored transposed: (E, C)
        "w2": jax.random.normal(ks[10], (e, c), jnp.float32) * (1.0 / jnp.sqrt(e)),
        "b2": 0.01 * jax.random.normal(ks[11], (c,), jnp.float32),
    }


def fold_params(raw, eps=1e-5):
    """Fold eval-mode BatchNorms into the adjacent Linears, pad classes to 128 lanes,
    and cast weights to bf16 (biases stay f32).  Padded-class bias is -1e30; this is
    only safe because the kernel keeps logits in f32 end-to-end."""
    f, e = raw["w1"].shape
    c = raw["w2"].shape[1]
    c_pad = _round_up(c, 128)

    # BN1 -> Linear1 fold (exact: dropout is identity in eval)
    s1 = raw["bn1_w"] / jnp.sqrt(raw["bn1_var"] + eps)
    t1 = raw["bn1_b"] - raw["bn1_mean"] * s1
    w1f = raw["w1"] * s1[:, None]
    b1f = t1 @ raw["w1"] + raw["b1"]

    # BN2 -> Linear2 fold
    s2 = raw["bn2_w"] / jnp.sqrt(raw["bn2_var"] + eps)
    t2 = raw["bn2_b"] - raw["bn2_mean"] * s2
    w2f = raw["w2"] * s2[:, None]
    b2f = t2 @ raw["w2"] + raw["b2"]

    if c_pad != c:
        w2f = jnp.pad(w2f, ((0, 0), (0, c_pad - c)))
        b2f = jnp.pad(b2f, (0, c_pad - c), constant_values=-1e30)

    return {
        "w1": w1f.astype(jnp.bfloat16),
        "b1": b1f.reshape(1, e).astype(jnp.float32),
        "w2": w2f.astype(jnp.bfloat16),
        "b2": b2f.reshape(1, c_pad).astype(jnp.float32),
    }


def reference(x, raw, eps=1e-5):
    """Pure-JAX f32 reference of the PyTorch eval forward pass."""
    s1 = raw["bn1_w"] / jnp.sqrt(raw["bn1_var"] + eps)
    h = (x - raw["bn1_mean"]) * s1 + raw["bn1_b"]
    h = jnp.maximum(h @ raw["w1"] + raw["b1"], 0.0)
    s2 = raw["bn2_w"] / jnp.sqrt(raw["bn2_var"] + eps)
    h = (h - raw["bn2_mean"]) * s2 + raw["bn2_b"]
    logits = h @ raw["w2"] + raw["b2"]
    return jax.nn.softmax(logits, axis=1)


if __name__ == "__main__":
    B, F, E, C = 8, 32, 128, 16   # batch, input_features, emb_size, num_classes

    key = jax.random.PRNGKey(0)
    kx, kp = jax.random.split(key)
    x = jax.random.normal(kx, (B, F), jnp.float32)
    raw = make_raw_params(kp, F, E, C)
    folded = fold_params(raw)

    run = jax.jit(functools.partial(classification_output_layer, num_classes=C))
    out = jax.block_until_ready(run(x, folded))

    ref = reference(x, raw)
    assert out.shape == (B, C), f"bad shape {out.shape}"
    # bf16 matmul operands + bf16 probability writeback -> relaxed tolerances
    assert jnp.allclose(out, ref, atol=2e-2, rtol=2e-2), "mismatch vs reference"
    assert jnp.allclose(jnp.sum(out, axis=1), 1.0, atol=3e-2), "softmax rows must sum to ~1"

    print("KERNEL_OK")
</pallas_src>

<mosaic_0001>
module attributes {stable_mosaic.version = 11 : i64} {
  func.func @_cls_head_kernel(%arg0: i32, %arg1: memref<8x32xf32, #tpu.memory_space<vmem>>, %arg2: memref<32x128xbf16, #tpu.memory_space<vmem>>, %arg3: memref<1x128xf32, #tpu.memory_space<vmem>>, %arg4: memref<128x128xbf16, #tpu.memory_space<vmem>>, %arg5: memref<1x128xf32, #tpu.memory_space<vmem>>, %arg6: memref<8x128xbf16, #tpu.memory_space<vmem>>) attributes {dimension_semantics = [#tpu.dimension_semantics<parallel>], iteration_bounds = array<i64: 1>, scalar_prefetch = 0 : i64, scratch_operands = 0 : i64, tpu.core_type = #tpu.core_type<tc>, window_params = [{transform_indices = @transform_0, window_bounds = array<i64: 8, 32>}, {pipeline_mode = #tpu.pipeline_mode<synchronous>, transform_indices = @transform_1, window_bounds = array<i64: 32, 128>}, {pipeline_mode = #tpu.pipeline_mode<synchronous>, transform_indices = @transform_2, window_bounds = array<i64: 1, 128>}, {pipeline_mode = #tpu.pipeline_mode<synchronous>, transform_indices = @transform_3, window_bounds = array<i64: 128, 128>}, {pipeline_mode = #tpu.pipeline_mode<synchronous>, transform_indices = @transform_4, window_bounds = array<i64: 1, 128>}, {transform_indices = @transform_5, window_bounds = array<i64: 8, 128>}]} {
    %c0 = arith.constant 0 : index
    %c0_0 = arith.constant 0 : index
    %0 = vector.load %arg1[%c0, %c0_0] : memref<8x32xf32, #tpu.memory_space<vmem>>, vector<8x32xf32>
    %1 = arith.truncf %0 : vector<8x32xf32> to vector<8x32xbf16>
    %c0_1 = arith.constant 0 : index
    %c0_2 = arith.constant 0 : index
    %2 = vector.load %arg2[%c0_1, %c0_2] : memref<32x128xbf16, #tpu.memory_space<vmem>>, vector<32x128xbf16>
    %cst = arith.constant dense<0.000000e+00> : vector<8x128xf32>
    %3 = tpu.matmul %1, %2, %cst {dimension_numbers = #tpu.dot_dimension_numbers<[1], [0], [0], [1], [0, 0, 1, 1], [], []>} : vector<8x32xbf16>, vector<32x128xbf16>, vector<8x128xf32> -> vector<8x128xf32>
    %c0_3 = arith.constant 0 : index
    %c0_4 = arith.constant 0 : index
    %4 = vector.load %arg3[%c0_3, %c0_4] : memref<1x128xf32, #tpu.memory_space<vmem>>, vector<1x128xf32>
    %5 = vector.broadcast %4 : vector<1x128xf32> to vector<8x128xf32>
    %6 = arith.addf %3, %5 : vector<8x128xf32>
    %cst_5 = arith.constant 0.000000e+00 : f32
    %7 = vector.broadcast %cst_5 : f32 to vector<8x128xf32>
    %8 = arith.maximumf %6, %7 : vector<8x128xf32>
    %9 = arith.truncf %8 : vector<8x128xf32> to vector<8x128xbf16>
    %c0_6 = arith.constant 0 : index
    %c0_7 = arith.constant 0 : index
    %10 = vector.load %arg4[%c0_6, %c0_7] : memref<128x128xbf16, #tpu.memory_space<vmem>>, vector<128x128xbf16>
    %cst_8 = arith.constant dense<0.000000e+00> : vector<8x128xf32>
    %11 = tpu.matmul %9, %10, %cst_8 {dimension_numbers = #tpu.dot_dimension_numbers<[1], [0], [0], [1], [0, 0, 1, 1], [], []>} : vector<8x128xbf16>, vector<128x128xbf16>, vector<8x128xf32> -> vector<8x128xf32>
    %c0_9 = arith.constant 0 : index
    %c0_10 = arith.constant 0 : index
    %12 = vector.load %arg5[%c0_9, %c0_10] : memref<1x128xf32, #tpu.memory_space<vmem>>, vector<1x128xf32>
    %13 = vector.broadcast %12 : vector<1x128xf32> to vector<8x128xf32>
    %14 = arith.addf %11, %13 : vector<8x128xf32>
    %cst_11 = arith.constant dense<0xFF800000> : vector<8xf32>
    %15 = vector.multi_reduction <maximumf>, %14, %cst_11 [1] : vector<8x128xf32> to vector<8xf32>
    %16 = vector.shape_cast %15 : vector<8xf32> to vector<8x1xf32>
    %17 = vector.broadcast %16 : vector<8x1xf32> to vector<8x128xf32>
    %18 = arith.subf %14, %17 : vector<8x128xf32>
    %19 = math.exp %18 : vector<8x128xf32>
    %cst_12 = arith.constant dense<0.000000e+00> : vector<8xf32>
    %20 = vector.multi_reduction <add>, %19, %cst_12 [1] : vector<8x128xf32> to vector<8xf32>
    %21 = vector.shape_cast %20 : vector<8xf32> to vector<8x1xf32>
    %22 = tpu.reciprocal %21 {approx = true} : vector<8x1xf32> -> vector<8x1xf32>
    %23 = arith.mulf %21, %22 : vector<8x1xf32>
    %cst_13 = arith.constant 2.000000e+00 : f32
    %24 = vector.broadcast %cst_13 : f32 to vector<8x1xf32>
    %25 = arith.subf %24, %23 : vector<8x1xf32>
    %26 = arith.mulf %22, %25 : vector<8x1xf32>
    %27 = vector.broadcast %26 : vector<8x1xf32> to vector<8x128xf32>
    %28 = arith.mulf %19, %27 : vector<8x128xf32>
    %29 = arith.truncf %28 : vector<8x128xf32> to vector<8x128xbf16>
    %c0_14 = arith.constant 0 : index
    %c0_15 = arith.constant 0 : index
    %30 = vector.load %arg6[%c0_14, %c0_15] : memref<8x128xbf16, #tpu.memory_space<vmem>>, vector<8x128xbf16>
    tpu.vector_store %arg6[%c0_14, %c0_15], %29 {strides = array<i32>} : memref<8x128xbf16, #tpu.memory_space<vmem>>, vector<8x128xbf16>,
    return
  }
  func.func @transform_0(%arg0: i32) -> (i32, i32) {
    %c0_i32 = arith.constant 0 : i32
    %c0_i32_0 = arith.constant 0 : i32
    return %arg0, %c0_i32 : i32, i32
  }
  func.func @transform_1(%arg0: i32) -> (i32, i32) {
    %c0_i32 = arith.constant 0 : i32
    %c0_i32_0 = arith.constant 0 : i32
    %c0_i32_1 = arith.constant 0 : i32
    return %c0_i32, %c0_i32_0 : i32, i32
  }
  func.func @transform_2(%arg0: i32) -> (i32, i32) {
    %c0_i32 = arith.constant 0 : i32
    %c0_i32_0 = arith.constant 0 : i32
    %c0_i32_1 = arith.constant 0 : i32
    return %c0_i32, %c0_i32_0 : i32, i32
  }
  func.func @transform_3(%arg0: i32) -> (i32, i32) {
    %c0_i32 = arith.constant 0 : i32
    %c0_i32_0 = arith.constant 0 : i32
    %c0_i32_1 = arith.constant 0 : i32
    return %c0_i32, %c0_i32_0 : i32, i32
  }
  func.func @transform_4(%arg0: i32) -> (i32, i32) {
    %c0_i32 = arith.constant 0 : i32
    %c0_i32_0 = arith.constant 0 : i32
    %c0_i32_1 = arith.constant 0 : i32
    return %c0_i32, %c0_i32_0 : i32, i32
  }
  func.func @transform_5(%arg0: i32) -> (i32, i32) {
    %c0_i32 = arith.constant 0 : i32
    %c0_i32_0 = arith.constant 0 : i32
    return %arg0, %c0_i32 : i32, i32
  }
}

</mosaic_0001>

<bundles_post_ra>
// kernel: classification_output_layer.1
= control target key start
LH: loop header
LB: loop body
LE: loop exit
PB: predicated region body
PF: predicated region fallthrough
CT: control target
= control target key end

     0   :  { %10 = vsyncpa [#allocation3], 0  ;;  %s455_s0 = inlined_call_operand.hbm [shape: f32[8,32], index: 0, kind: input, shape index: {}]   ;;  %s456_s1 = inlined_call_operand.hbm [shape: bf16[32,128], index: 1, kind: input, shape index: {}]   ;;  %s457_s2 = inlined_call_operand.vmem [shape: f32[1,128], index: 2, kind: input, shape index: {}]   ;;  %s458_s3 = inlined_call_operand.hbm [shape: bf16[128,128], index: 3, kind: input, shape index: {}]   ;;  %s459_s4 = inlined_call_operand.vmem [shape: f32[1,128], index: 4, kind: input, shape index: {}]   ;;  %s460_s5 = inlined_call_operand.vmem [shape: bf16[8,128], index: 5, kind: output, shape index: {}]  }
   0x1   :  { %11 = vsyncpa [#allocation5], 0  ;;  %s400_s18 = smov [#allocation4]  }
   0x2   :  { %s27_s19 = sshll.u32 %s400_s18, 4  ;;  %s28_s19 = int_to_ptr.vmem [resolvable:$true] %s27_s19 }
   0x3   :  { %s344_s20 = scalar_lea.vmem %s28_s19, 256  ;;  %p349_p1 = scmp.lt.s32.totalorder %s28_s19, %s28_s19 }
   0x4   :  { %p345_p0 = scmp.ne.s32.totalorder %s28_s19, %s344_s20  ;;  %p350_p2 = scmp.lt.s32.totalorder %s344_s20, %s344_s20 }
   0x6   :  { %p351_p3 = por %p350_p2, %p349_p1 }
   0x8   :  { %p352_p4 = pnand %p351_p3, %p345_p0 }
   0xa   :  { %355 = shalt.err (!%p352_p4)
}
   0xb   :  { %s401_s21 = smov 64   ;;  %s402_s22 = smov 4  }
   0xc   :  { %33 = dma.hbm_to_vmem [thread:$0]  %s456_s1, 256, %s28_s19, [#allocation5], %s401_s21, %s401_s21, %s402_s22  }
   0xd   :  { %s403_s25 = smov [#allocation2]   ;;  %s404_s27 = smov [#allocation6]  }
   0xe   :  { %s18_s26 = sshll.u32 %s403_s25, 4  ;;  %s41_s28 = sshll.u32 %s404_s27, 4  ;;  %s19_s26 = int_to_ptr.vmem [resolvable:$true] %s18_s26  ;;  %s42_s28 = int_to_ptr.vmem [resolvable:$true] %s41_s28 }
   0xf   :  { %s364_s29 = scalar_lea.vmem %s19_s26, 128  ;;  %p369_p6 = scmp.lt.s32.totalorder %s19_s26, %s19_s26 }
  0x10   :  { %p365_p5 = scmp.ne.s32.totalorder %s19_s26, %s364_s29  ;;  %p370_p7 = scmp.lt.s32.totalorder %s364_s29, %s364_s29 }
  0x12   :  { %p371_p8 = por %p370_p7, %p369_p6 }
  0x14   :  { %p372_p9 = pnand %p371_p8, %p365_p5 }
  0x16   :  { %375 = shalt.err (!%p372_p9)
}
  0x17   :  { %21 = dma.hbm_to_vmem [thread:$0]  %s455_s0, 128, %s19_s26, [#allocation3]  }
  0x18   :  { %s384_s7 = scalar_lea.vmem %s42_s28, 1024  ;;  %p389_p11 = scmp.lt.s32.totalorder %s42_s28, %s42_s28 }
  0x19   :  { %p385_p10 = scmp.ne.s32.totalorder %s42_s28, %s384_s7  ;;  %p390_p12 = scmp.lt.s32.totalorder %s384_s7, %s384_s7 }
  0x1b   :  { %p391_p13 = por %p390_p12, %p389_p11 }
  0x1d   :  { %p392_p0 = pnand %p391_p13, %p385_p10 }
  0x1f   :  { %395 = shalt.err (!%p392_p0)
}
  0x20   :  { %47 = dma.hbm_to_vmem [thread:$0]  %s458_s3, 1024, %s42_s28, [#allocation5], %s401_s21, %s401_s21, %s402_s22  }
  0x21   :  { %396 = dma.done.wait [#allocation3], 128  }
  0x22   :  { %397 = vsyncadd [#allocation3], 4294967168 }
  0x23   :  { %398 = dma.done.wait [#allocation5], 1280  }
  0x24   :  { %399 = vsyncadd [#allocation5], 4294966016  ;;  %v405_v0 = vmov 0.0   ;;  %vm406_vm0 = vmmov 0   ;;  %v322_v1 = vld [vmem:[#allocation4 + $0x8] sm:$0xff]   ;;  %v323_v2 = vld [vmem:[#allocation4] sm:$0xff]  }
  0x25   :  { %287 = vmatprep.subr.bf16.mxu0 %v405_v0  ;;  %291 = vmatprep.mubr.msk.bf16.mxu0 %vm406_vm0, %v405_v0  ;;  %v60_v3 = vld [vmem:[#allocation2] sm:$0xff]  ;;  %v324_v4 = vld [vmem:[#allocation6 + $0x38] sm:$0xff]   ;;  %v325_v6 = vld [vmem:[#allocation6 + $0x30] sm:$0xff]   ;;  %vm85_vm1 = vcmask 261120  }
  0x26   :  { %295 = vmatprep.subr.bf16.mxu1 %v405_v0  ;;  %311 = vmatprep.mubr.msk.bf16.mxu1 %vm406_vm0, %v405_v0  ;;  %v61_v5 = vpack.c.bf16 %v60_v3, %v60_v3  ;;  %v326_v7 = vld [vmem:[#allocation6 + $0x28] sm:$0xff]   ;;  %v327_v8 = vld [vmem:[#allocation6 + $0x20] sm:$0xff]   ;;  %v328_v9 = vld [vmem:[#allocation6 + $0x18] sm:$0xff]  }
  0x27   :  { %288 = vmatpush3.bf16.msra.mxu0 %v322_v1  ;;  %296 = vmatpush3.bf16.msra.mxu1 %v324_v4  ;;  %v329_v10 = vld [vmem:[#allocation6 + $0x10] sm:$0xff]   ;;  %v330_v11 = vld [vmem:[#allocation6 + $0x8] sm:$0xff]   ;;  %v331_v12 = vld [vmem:[#allocation6] sm:$0xff]  }
  0x28   :  { %289 = vmatprep.subr.bf16.mxu0 %v405_v0  ;;  %297 = vmatprep.subr.bf16.mxu1 %v405_v0  ;;  %v262_v13 = vld [vmem:[%s457_s2] ss:$0 sm:$0xff] }
  0x29   :  { %v266_v21 = vld [vmem:[%s459_s4] ss:$0 sm:$0xff] }
  0x2b   :  { %290 = vmatpush3.bf16.msra.mxu0 %v323_v2  ;;  %298 = vmatpush3.bf16.msra.mxu1 %v325_v6 }
  0x2c   :  { %299 = vmatprep.subr.bf16.mxu1 %v405_v0 }
  0x2e   :  { %292 = vmatmul.mubr.msk.bf16.vlgmr.msra.gmra.mxu0 %vm85_vm1, %v61_v5 }
  0x2f   :  { %300 = vmatpush3.bf16.msra.mxu1 %v326_v7 }
  0x30   :  { %301 = vmatprep.subr.bf16.mxu1 %v405_v0 }
  0x33   :  { %302 = vmatpush3.bf16.msra.mxu1 %v327_v8 }
  0x34   :  { %303 = vmatprep.subr.bf16.mxu1 %v405_v0 }
  0x37   :  { %304 = vmatpush3.bf16.msra.mxu1 %v328_v9 }
  0x38   :  { %305 = vmatprep.subr.bf16.mxu1 %v405_v0 }
  0x3b   :  { %306 = vmatpush3.bf16.msra.mxu1 %v329_v10 }
  0x3c   :  { %307 = vmatprep.subr.bf16.mxu1 %v405_v0 }
  0x3f   :  { %308 = vmatpush3.bf16.msra.mxu1 %v330_v11 }
  0x40   :  { %309 = vmatprep.subr.bf16.mxu1 %v405_v0 }
  0x43   :  { %310 = vmatpush3.bf16.msra.mxu1 %v331_v12 }
  0xee   :  { %v123_v14 = vpop.f32.mrf.mxu0 }
  0xef   :  { %v124_v15 = vadd.f32 %v262_v13, %v123_v14 }
  0xf0   :  { %v293_v16 = vpop.f32.mrf.mxu0 }
  0xf1   :  { %v129_v17 = vmax.f32 %v124_v15, 0.0 }
  0xf2   :  { %v126_v18 = vpop.f32.mrf.mxu0 }
  0xf3   :  { %v130_v19 = vpack.c.bf16 %v129_v17, %v129_v17 }
  0xf4   :  { %v294_v20 = vpop.f32.mrf.mxu0 }
  0xf5   :  { %312 = vmatmul.mubr.bf16.vlgmr.msra.gmra.mxu1 %v130_v19 }
 0x1b5   :  { %v236_v22 = vpop.f32.mrf.mxu1 }
 0x1b6   :  { %v237_v23 = vadd.f32 %v266_v21, %v236_v22 }
 0x1b7   :  { %v313_v24 = vpop.f32.mrf.mxu1 }
 0x1b8   :  { %242 = vmax.xlane.f32.xlu0 %v237_v23 }
 0x1b9   :  { %v239_v25 = vpop.f32.mrf.mxu1 }
 0x1bb   :  { %v314_v26 = vpop.f32.mrf.mxu1 }
 0x241   :  { %v243_v27 = vpop.xlane.xlu0 %242 }
 0x242   :  { %v244_v28 = vsub.f32 %v237_v23, %v243_v27 }
 0x244   :  { %v245_v29 = vmul.f32 1.442695, %v244_v28 }
 0x246   :  { %332 = vpow2.f32 %v245_v29 }
 0x253   :  { %v333_v30 = vpop.eup %332 }
 0x254   :  { %247 = vadd.xlane.f32.xlu0 %v333_v30 }
 0x2dd   :  { %v248_v31 = vpop.xlane.xlu0 %247 }
 0x2de   :  { %334 = vrcp.f32 %v248_v31 }
 0x2eb   :  { %v335_v32 = vpop.eup %334 }
 0x2ec   :  { %v250_v33 = vmul.f32 %v335_v32, %v248_v31 }
 0x2ee   :  { %v251_v34 = vsub.f32 2.0, %v250_v33 }
 0x2f0   :  { %v252_v35 = vmul.f32 %v335_v32, %v251_v34 }
 0x2f2   :  { %v253_v36 = vmul.f32 %v333_v30, %v252_v35 }
 0x2f4   :  { %v254_v37 = vpack.c.bf16 %v253_v36, %v253_v36 }
 0x2f6   :  { %255 = vst [vmem:[%s460_s5] sm:$0xf] %v254_v37 }
 0x2f7   :  { %260 = vsyncpa [#allocation3], 1 }
 0x2f8   :  { %261 = vsyncpa [#allocation5], 1 }

</bundles_post_ra>
